<compile_context>
chip_gen: v5e
topology: v5e:2x2
jax: 0.10.0
libtpu: 0.0.40
codegen_flags: <defaults>
</compile_context>

<pallas_src>
import math

import numpy as np
import jax
import jax.numpy as jnp
from jax import lax
from jax.experimental import pallas as pl
from jax.experimental.pallas import tpu as pltpu


_LANE = 128                 # hardware lane width
_TARGET_LANES = 512         # preferred folded lane width for per-lane thresholds
_SMALL_N = 1 << 16          # below this, masked-lane stores are in the noise
_ROW_ALIGN = 32             # row-block granularity (covers f32/bf16/int8 tiling)
_VMEM_LIMIT_CACHE = None


def _vmem_limit():
    """Scoped VMEM limit derived from the actual chip (cached, conservative fallback)."""
    global _VMEM_LIMIT_CACHE
    if _VMEM_LIMIT_CACHE is None:
        cap = 0
        try:
            cap = int(getattr(pltpu.get_tpu_info(), "vmem_capacity_bytes", 0))
        except Exception:
            cap = 0
        if cap <= 0:
            cap = 64 * 1024 * 1024          # v7x has the smallest VMEM -> safe default
        # leave >= 25% headroom under physical VMEM, never ask for more than 96 MiB
        _VMEM_LIMIT_CACHE = int(min(3 * cap // 4, 96 * 1024 * 1024))
    return _VMEM_LIMIT_CACHE


def _compiler_params(*semantics):
    return pltpu.CompilerParams(dimension_semantics=tuple(semantics),
                                vmem_limit_bytes=_vmem_limit())


def _block_elems_budget(in_bytes, out_bytes, live_bytes=0):
    """Max elements per block: double-buffered in/out pipeline + in-kernel live
    copies, targeting ~2/3 of the scoped VMEM limit."""
    per_elem = 2 * (int(in_bytes) + int(out_bytes)) + int(live_bytes)
    return max(8 * _LANE, (2 * _vmem_limit() // 3) // max(per_elem, 1))


def _block_rows(rows, lanes, budget_elems, block_rows=None):
    """Rows per block (multiple of _ROW_ALIGN unless spanning the full row dim)."""
    if block_rows is not None:
        cap = max(_ROW_ALIGN, (int(block_rows) // _ROW_ALIGN) * _ROW_ALIGN)
    else:
        cap = max(_ROW_ALIGN,
                  (budget_elems // max(lanes, 1)) // _ROW_ALIGN * _ROW_ALIGN)
        if 2 * _ROW_ALIGN <= rows <= cap:
            # The whole slab would fit in one block: split ~in half so both of
            # v7x's TensorCores get a "parallel" grid step (also hides per-step
            # overhead on 1-TC chips for negligible cost).
            half = (((rows + 1) // 2) + _ROW_ALIGN - 1) // _ROW_ALIGN * _ROW_ALIGN
            cap = min(cap, half)
    return rows if rows <= cap else cap


def _lane_dense_2d(scores):
    """Reshape-only (free) 2-D lane-friendly view of `scores`.

    Returns (scores_2d, padded_len): padded_len is None when no data movement
    was needed, else the flat padded length (rare fallback).
    """
    n = int(scores.size)
    if n % _LANE == 0:
        lanes = _LANE
        for c in (2048, 1024, 512, 256):
            if n % c == 0:
                lanes = c
                break
        return scores.reshape(n // lanes, lanes), None
    if scores.ndim >= 2:
        last = int(scores.shape[-1])
        if last >= _LANE or n <= _SMALL_N:
            # full-dim lane blocks: mostly-dense stores, zero extra HBM traffic
            return scores.reshape(n // last, last), None
    if n <= _SMALL_N:
        return scores.reshape(1, n), None
    # TODO(synk): rare fallback (large flat array, size not a multiple of 128,
    # tiny last dim): the pad + final slice cost one extra HBM pass.
    lanes = 512
    padded = int(pl.cdiv(n, lanes)) * lanes
    flat = jnp.pad(scores.reshape(n), (0, padded - n))
    return flat.reshape(padded // lanes, lanes), padded


# ----------------------------------------------------------------------------
# Single-threshold / per-lane-threshold predict
# ----------------------------------------------------------------------------
def _predict_scalar(scores, thr, cmp_dtype, out_dtype, block_rows):
    orig_shape = scores.shape
    n = int(scores.size)
    s2d, padded = _lane_dense_2d(scores)
    rows, lanes = int(s2d.shape[0]), int(s2d.shape[1])
    budget = _block_elems_budget(s2d.dtype.itemsize, np.dtype(out_dtype).itemsize,
                                 live_bytes=np.dtype(cmp_dtype).itemsize)
    br = _block_rows(rows, lanes, budget, block_rows)

    def kernel(thr_ref, s_ref, o_ref):
        t = thr_ref[0].astype(cmp_dtype)
        o_ref[...] = (s_ref[...].astype(cmp_dtype) > t).astype(o_ref.dtype)

    out2d = pl.pallas_call(
        kernel,
        out_shape=jax.ShapeDtypeStruct((rows, lanes), out_dtype),
        grid=(pl.cdiv(rows, br),),
        in_specs=[pl.BlockSpec(memory_space=pltpu.MemorySpace.SMEM),  # scalar thr
                  pl.BlockSpec((br, lanes), lambda i: (i, 0))],
        out_specs=pl.BlockSpec((br, lanes), lambda i: (i, 0)),
        compiler_params=_compiler_params("parallel"),
    )(thr, s2d)

    if padded is not None:
        return out2d.reshape(padded)[:n].reshape(orig_shape)
    return out2d.reshape(orig_shape)


def _predict_per_lane(scores, thr, cmp_dtype, out_dtype, block_rows):
    orig_shape = scores.shape
    L = int(thr.shape[0])
    rows = int(scores.size) // L
    s2d = scores.reshape(rows, L)

    fold, pad_rows = 1, 0
    if L < _LANE:
        base = _LANE // math.gcd(L, _LANE)        # smallest f with L*f % 128 == 0
        target = max(base, -(-_TARGET_LANES // L))
        if rows % target == 0:
            fold = target
        elif rows % base == 0:
            fold = base
        else:
            # pad < base rows so the output stays >= 128 lanes (dense vst)
            fold = base
            pad_rows = (-rows) % base
            s2d = jnp.pad(s2d, ((0, pad_rows), (0, 0)))
    lanes = L * fold
    rows2 = (rows + pad_rows) // fold
    s2d = s2d.reshape(rows2, lanes)
    thr_row = jnp.tile(thr.reshape(1, L), (1, fold)) if fold > 1 else thr.reshape(1, L)

    budget = _block_elems_budget(s2d.dtype.itemsize, np.dtype(out_dtype).itemsize,
                                 live_bytes=np.dtype(cmp_dtype).itemsize)
    br = _block_rows(rows2, lanes, budget, block_rows)

    def kernel(s_ref, thr_ref, o_ref):
        t = thr_ref[...].astype(cmp_dtype)
        o_ref[...] = (s_ref[...].astype(cmp_dtype) > t).astype(o_ref.dtype)

    out2d = pl.pallas_call(
        kernel,
        out_shape=jax.ShapeDtypeStruct((rows2, lanes), out_dtype),
        grid=(pl.cdiv(rows2, br),),
        in_specs=[pl.BlockSpec((br, lanes), lambda i: (i, 0)),
                  pl.BlockSpec((1, lanes), lambda i: (0, 0))],   # resident thr row
        out_specs=pl.BlockSpec((br, lanes), lambda i: (i, 0)),
        compiler_params=_compiler_params("parallel"),
    )(s2d, thr_row)

    if pad_rows:
        return out2d.reshape(rows + pad_rows, L)[:rows].reshape(orig_shape)
    return out2d.reshape(orig_shape)


def threshold_predict(scores, thresholds, *, out_dtype=jnp.int8, block_rows=None):
    """Pallas equivalent of (scores > thresholds).astype(out_dtype).

    int8 default is the primary perf switch on this HBM-bound op; pass
    out_dtype=jnp.int32 for a torch-.long()-like result (int64 unavailable
    under JAX's no-x64 default).
    """
    scores = jnp.asarray(scores)
    thr = jnp.asarray(thresholds, dtype=jnp.float32).reshape(-1)
    if scores.size == 0:
        return jnp.zeros(scores.shape, out_dtype)
    cmp_dtype = jnp.promote_types(scores.dtype, thr.dtype)
    n_thr = int(thr.shape[0])
    if n_thr == 1:
        return _predict_scalar(scores, thr, cmp_dtype, out_dtype, block_rows)
    if scores.ndim == 0 or n_thr != int(scores.shape[-1]):
        raise ValueError(
            f"thresholds of size {n_thr} do not broadcast against scores of shape "
            f"{scores.shape} (need size 1 or last-dim match, like torch.gt).")
    return _predict_per_lane(scores, thr, cmp_dtype, out_dtype, block_rows)


# ----------------------------------------------------------------------------
# Fused multi-threshold kernels
# ----------------------------------------------------------------------------
def threshold_predict_many(scores, thresholds_vec, *, out_dtype=jnp.int8,
                           block_rows=None, thresholds_per_step=8):
    """preds[t] = scores > thresholds_vec[t] (fused sweep).

    Scores are read from HBM once per row tile for all thresholds (threshold
    axis is the inner sequential grid axis and the scores block index does not
    depend on it); several prediction maps are emitted per grid step to
    amortize the fixed per-step cost.
    """
    scores = jnp.asarray(scores)
    thr = jnp.asarray(thresholds_vec, dtype=jnp.float32).reshape(-1)
    T = int(thr.shape[0])
    orig_shape = scores.shape
    if T == 0 or scores.size == 0:
        return jnp.zeros((T,) + orig_shape, out_dtype)
    cmp_dtype = jnp.promote_types(scores.dtype, thr.dtype)
    n = int(scores.size)

    s2d, padded = _lane_dense_2d(scores)
    rows, lanes = int(s2d.shape[0]), int(s2d.shape[1])

    tb = 1                                 # largest divisor of T <= thresholds_per_step
    for c in range(min(T, max(1, int(thresholds_per_step))), 0, -1):
        if T % c == 0:
            tb = c
            break

    out_bytes = np.dtype(out_dtype).itemsize
    budget = _block_elems_budget(s2d.dtype.itemsize, tb * out_bytes,
                                 live_bytes=np.dtype(cmp_dtype).itemsize)
    br = _block_rows(rows, lanes, budget, block_rows)

    def kernel(thr_ref, s_ref, o_ref):
        t0 = pl.program_id(1) * tb
        s = s_ref[...].astype(cmp_dtype)
        for j in range(tb):                # static unroll over this step's thresholds
            o_ref[j, :, :] = (s > thr_ref[t0 + j].astype(cmp_dtype)).astype(o_ref.dtype)

    out = pl.pallas_call(
        kernel,
        out_shape=jax.ShapeDtypeStruct((T, rows, lanes), out_dtype),
        grid=(pl.cdiv(rows, br), T // tb),
        in_specs=[pl.BlockSpec(memory_space=pltpu.MemorySpace.SMEM),  # all thresholds
                  pl.BlockSpec((br, lanes), lambda i, t: (i, 0))],
        out_specs=pl.BlockSpec((tb, br, lanes), lambda i, t: (t, i, 0)),
        compiler_params=_compiler_params("parallel", "arbitrary"),
    )(thr, s2d)

    if padded is not None:
        return out.reshape(T, padded)[:, :n].reshape((T,) + orig_shape)
    return out.reshape((T,) + orig_shape)


def threshold_exceed_count(scores, thresholds_sorted, *, out_dtype=jnp.int32,
                           block_rows=None):
    """count[x] = #{t : scores[x] > thresholds_sorted[t]} (ascending thresholds).

    One HBM read of scores and one small count map written (instead of T
    prediction maps); individual maps are reconstructed as (count > t).
    """
    scores = jnp.asarray(scores)
    thr = jnp.asarray(thresholds_sorted, dtype=jnp.float32).reshape(-1)
    T = int(thr.shape[0])
    orig_shape = scores.shape
    if T == 0 or scores.size == 0:
        return jnp.zeros(orig_shape, out_dtype)
    cmp_dtype = jnp.promote_types(scores.dtype, thr.dtype)
    n = int(scores.size)

    s2d, padded = _lane_dense_2d(scores)
    rows, lanes = int(s2d.shape[0]), int(s2d.shape[1])
    out_bytes = np.dtype(out_dtype).itemsize
    budget = _block_elems_budget(s2d.dtype.itemsize, out_bytes,
                                 live_bytes=np.dtype(cmp_dtype).itemsize + out_bytes)
    br = _block_rows(rows, lanes, budget, block_rows)

    def kernel(thr_ref, s_ref, o_ref):
        o_ref[...] = jnp.zeros_like(o_ref)

        def body(t, carry):
            s = s_ref[...].astype(cmp_dtype)
            o_ref[...] += (s > thr_ref[t].astype(cmp_dtype)).astype(o_ref.dtype)
            return carry

        lax.fori_loop(0, T, body, 0)

    out2d = pl.pallas_call(
        kernel,
        out_shape=jax.ShapeDtypeStruct((rows, lanes), out_dtype),
        grid=(pl.cdiv(rows, br),),
        in_specs=[pl.BlockSpec(memory_space=pltpu.MemorySpace.SMEM),
                  pl.BlockSpec((br, lanes), lambda i: (i, 0))],
        out_specs=pl.BlockSpec((br, lanes), lambda i: (i, 0)),
        compiler_params=_compiler_params("parallel"),
    )(thr, s2d)

    if padded is not None:
        return out2d.reshape(padded)[:n].reshape(orig_shape)
    return out2d.reshape(orig_shape)


# ----------------------------------------------------------------------------
# Module
# ----------------------------------------------------------------------------
class ThresholdModule:
    """JAX/Pallas port of the PyTorch ThresholdModule (forward = predict)."""

    def __init__(self, num_thresholds: int = 1, threshold_min: float = 0.0,
                 threshold_max: float = 1.0, threshold_delta: float = 0.01):
        self.num_thresholds = num_thresholds
        self.threshold_min = threshold_min
        self.threshold_max = threshold_max
        self.threshold_delta = threshold_delta
        # deterministic parameter init (matches torch.zeros(num_thresholds))
        self._thresholds = jnp.zeros((num_thresholds,), dtype=jnp.float32)

    @property
    def thresholds(self):
        return self._thresholds

    def forward(self, scores):
        return self.predict(scores, self.thresholds)

    __call__ = forward

    def predict(self, scores, thresholds, out_dtype=jnp.int32):
        # TODO(synk): torch's .long() yields int64; int32 is the closest under
        # JAX's no-x64 default.  Pass out_dtype=jnp.int8 to cut HBM write
        # traffic 4x when the consumer only needs 0/1.
        return threshold_predict(scores, thresholds, out_dtype=out_dtype)

    def update_thresholds(self, new_value):
        self._thresholds = jnp.asarray(new_value, dtype=jnp.float32).reshape(
            self._thresholds.shape)

    def get_range(self, threshold_min=None, threshold_max=None, threshold_delta=None):
        return jnp.arange(
            self.threshold_min if threshold_min is None else threshold_min,
            self.threshold_max if threshold_max is None else threshold_max,
            self.threshold_delta if threshold_delta is None else threshold_delta,
            dtype=jnp.float32)

    def get_range_threshold_predictions(self, scores, threshold_min=None,
                                        threshold_max=None, threshold_delta=None):
        thr_range = self.get_range(threshold_min, threshold_max, threshold_delta)
        thr_np = np.asarray(thr_range)
        T = int(thr_np.shape[0])
        if T == 0:
            return
        if T == 1 or np.all(thr_np[1:] >= thr_np[:-1]):
            # Fused pass: scores read once, one count map written; per-threshold
            # maps reconstructed lazily (no T x int32 write amplification).
            counts = threshold_exceed_count(scores, thr_range)
            for i in range(T):
                yield (thr_range[i], (counts > i).astype(jnp.int32))
        else:
            for i in range(T):
                yield (thr_range[i],
                       threshold_predict(scores, thr_range[i:i + 1],
                                         out_dtype=jnp.int32))

    def get_range_predictions(self, scores, threshold_min=None,
                              threshold_max=None, threshold_delta=None):
        if self.num_thresholds == 1:
            yield from self.get_range_threshold_predictions(
                scores, threshold_min, threshold_max, threshold_delta)
        else:
            raise NotImplementedError('Still need to implement this properly')


if __name__ == "__main__":
    key = jax.random.PRNGKey(0)
    k1, k2, k3, k4, k5 = jax.random.split(key, 5)

    scores = jax.random.uniform(k1, (2, 4, 16, 16), dtype=jnp.float32)

    # 1) module forward with a scalar threshold (SMEM-scalar lane-dense path).
    module = ThresholdModule(num_thresholds=1)
    module.update_thresholds(jnp.array([0.5], dtype=jnp.float32))
    preds = jax.block_until_ready(module(scores))
    ref = (scores > module.thresholds).astype(jnp.int32)
    assert preds.shape == scores.shape and preds.dtype == jnp.int32
    np.testing.assert_array_equal(np.asarray(preds), np.asarray(ref))

    # 2) per-lane thresholds (num_thresholds == last dim), lane-folded layout.
    thr16 = jax.random.uniform(k2, (16,), dtype=jnp.float32)
    preds16 = jax.block_until_ready(threshold_predict(scores, thr16))
    np.testing.assert_array_equal(np.asarray(preds16),
                                  np.asarray((scores > thr16).astype(jnp.int8)))

    # 3) per-lane thresholds with row padding (rows % fold != 0).
    scores_pl = jax.random.uniform(k3, (3, 4, 16), dtype=jnp.float32)
    preds_pl = jax.block_until_ready(threshold_predict(scores_pl, thr16))
    np.testing.assert_array_equal(np.asarray(preds_pl),
                                  np.asarray((scores_pl > thr16).astype(jnp.int8)))

    # 4) odd element count (collapsed small-array path, no pad/slice).
    scores_odd = jax.random.uniform(k4, (3, 5, 7), dtype=jnp.float32)
    preds_odd = jax.block_until_ready(threshold_predict(scores_odd, jnp.float32(0.5)))
    np.testing.assert_array_equal(np.asarray(preds_odd),
                                  np.asarray((scores_odd > 0.5).astype(jnp.int8)))

    # 5) ragged row-tile grid (forced block_rows, multi-step parallel grid).
    scores_rag = jax.random.uniform(k5, (256, 1280), dtype=jnp.float32)
    preds_rag = jax.block_until_ready(
        threshold_predict(scores_rag, jnp.array([0.25], jnp.float32), block_rows=64))
    np.testing.assert_array_equal(np.asarray(preds_rag),
                                  np.asarray((scores_rag > 0.25).astype(jnp.int8)))

    # 6) bf16 scores (no wrapper up-cast; compare happens in-kernel in f32).
    scores_bf = scores.astype(jnp.bfloat16)
    preds_bf = jax.block_until_ready(threshold_predict(scores_bf, jnp.float32(0.5)))
    ref_bf = (scores_bf.astype(jnp.float32) > 0.5).astype(jnp.int8)
    np.testing.assert_array_equal(np.asarray(preds_bf), np.asarray(ref_bf))

    # 7) fused multi-threshold sweep (scores read once for all thresholds).
    thr_vec = jnp.array([0.1, 0.3, 0.5, 0.7, 0.9], dtype=jnp.float32)
    preds_many = jax.block_until_ready(threshold_predict_many(scores, thr_vec))
    ref_many = (scores[None] > thr_vec.reshape(5, 1, 1, 1, 1)).astype(jnp.int8)
    np.testing.assert_array_equal(np.asarray(preds_many), np.asarray(ref_many))

    # 8) range generator through the fused count kernel.
    for thr, p in module.get_range_threshold_predictions(scores, 0.0, 1.0, 0.25):
        p = jax.block_until_ready(p)
        r = (scores > thr).astype(jnp.int32)
        np.testing.assert_array_equal(np.asarray(p), np.asarray(r))

    print("KERNEL_OK")
</pallas_src>

<mosaic_0001>
module attributes {stable_mosaic.version = 11 : i64} {
  func.func @kernel(%arg0: i32, %arg1: memref<1xf32, #tpu.memory_space<smem>>, %arg2: memref<1x2048xf32, #tpu.memory_space<vmem>>, %arg3: memref<1x2048xi32, #tpu.memory_space<vmem>>) attributes {dimension_semantics = [#tpu.dimension_semantics<parallel>], iteration_bounds = array<i64: 1>, scalar_prefetch = 0 : i64, scratch_operands = 0 : i64, tpu.core_type = #tpu.core_type<tc>, window_params = [{transform_indices = @transform_0, window_bounds = array<i64: 1>}, {transform_indices = @transform_1, window_bounds = array<i64: 1, 2048>}, {transform_indices = @transform_2, window_bounds = array<i64: 1, 2048>}]} {
    %c0 = arith.constant 0 : index
    %0 = memref.load %arg1[%c0] : memref<1xf32, #tpu.memory_space<smem>>
    %c0_0 = arith.constant 0 : index
    %c0_1 = arith.constant 0 : index
    %1 = vector.load %arg2[%c0_0, %c0_1] : memref<1x2048xf32, #tpu.memory_space<vmem>>, vector<1x2048xf32>
    %2 = vector.broadcast %0 : f32 to vector<1x2048xf32>
    %3 = arith.cmpf ogt, %1, %2 : vector<1x2048xf32>
    %4 = arith.extui %3 : vector<1x2048xi1> to vector<1x2048xi32>
    %c0_2 = arith.constant 0 : index
    %c0_3 = arith.constant 0 : index
    %5 = vector.load %arg3[%c0_2, %c0_3] : memref<1x2048xi32, #tpu.memory_space<vmem>>, vector<1x2048xi32>
    tpu.vector_store %arg3[%c0_2, %c0_3], %4 {strides = array<i32>} : memref<1x2048xi32, #tpu.memory_space<vmem>>, vector<1x2048xi32>,
    return
  }
  func.func @transform_0(%arg0: i32) -> i32 {
    %c0_i32 = arith.constant 0 : i32
    %c0_i32_0 = arith.constant 0 : i32
    return %c0_i32 : i32
  }
  func.func @transform_1(%arg0: i32) -> (i32, i32) {
    %c0_i32 = arith.constant 0 : i32
    %c0_i32_0 = arith.constant 0 : i32
    return %arg0, %c0_i32 : i32, i32
  }
  func.func @transform_2(%arg0: i32) -> (i32, i32) {
    %c0_i32 = arith.constant 0 : i32
    %c0_i32_0 = arith.constant 0 : i32
    return %arg0, %c0_i32 : i32, i32
  }
}

</mosaic_0001>

<bundles_post_ra>
// kernel: tpu_custom_call.1
= control target key start
LH: loop header
LB: loop body
LE: loop exit
PB: predicated region body
PF: predicated region fallthrough
CT: control target
= control target key end

     0   :  { %8 = vsyncpa [#allocation4], 0  ;;  %s136_s0 = inlined_call_operand.<no memory space> [shape: f32[1], index: 0, kind: input, shape index: {}]   ;;  %s137_s1 = inlined_call_operand.hbm [shape: f32[1,2048], index: 1, kind: input, shape index: {}]   ;;  %s138_s2 = inlined_call_operand.hbm [shape: s32[1,2048], index: 2, kind: output, shape index: {}]  }
   0x1   :  { %9 = vsyncpa [#allocation5], 0  ;;  %s17_s11 = sshll.u32 %s137_s1, 4  ;;  %s109_s12 = smov [#allocation3]   ;;  %s18_s11 = int_to_ptr.hbm [resolvable:$true] %s17_s11 }
   0x2   :  { %s19_s13 = sshll.u32 %s109_s12, 4  ;;  %s20_s13 = int_to_ptr.vmem [resolvable:$true] %s19_s13 }
   0x3   :  { %22 = dma.hbm_to_vmem [thread:$0]  %s18_s11, 256, %s20_s13, [#allocation4]  }
   0x4   :  { %105 = dma.done.wait [#allocation4], 256  }
   0x5   :  { %106 = vsyncadd [#allocation4], 4294967040  ;;  %v30_v0 = vstv %s136_s0  ;;  %s110_s16 = smov [#allocation6]   ;;  %s44_s20 = sshll.u32 %s138_s2, 4  ;;  %v28_v1 = vld [vmem:[#allocation3] sm:$0xff]  ;;  %v29_v2 = vld [vmem:[#allocation3 + $0x8] sm:$0xff]  ;;  %s45_s20 = int_to_ptr.hbm [resolvable:$true] %s44_s20 }
   0x6   :  { %s42_s17 = sshll.u32 %s110_s16, 4  ;;  %vm31_vm0 = vcmp.gt.f32.partialorder %v28_v1, %v30_v0  ;;  %vm32_vm1 = vcmp.gt.f32.partialorder %v29_v2, %v30_v0  ;;  %v111_v3 = vmov 0   ;;  %s43_s17 = int_to_ptr.vmem [resolvable:$true] %s42_s17 }
   0x7   :  { %v33_v4 = vsel %vm31_vm0, 1, %v111_v3  ;;  %v34_v5 = vsel %vm32_vm1, 1, %v111_v3 }
   0x8   :  { %35 = vst [vmem:[#allocation6] sm:$0xff] %v33_v4 }
   0x9   :  { %36 = vst [vmem:[#allocation6 + $0x8] sm:$0xff] %v34_v5 }
   0xa   :  { %47 = dma.vmem_to_hbm [thread:$0]  %s43_s17, 256, %s45_s20, [#allocation5]  }
   0xb   :  { %107 = dma.done.wait [#allocation5], 256  }
   0xc   :  { %108 = vsyncadd [#allocation5], 4294967040 }
   0xd   :  { %52 = vsyncpa [#allocation4], 1 }
   0xe   :  { %53 = vsyncpa [#allocation5], 1 }

</bundles_post_ra>
